<compile_context>
chip_gen: v7x
topology: tpu7x:2x2x1
jax: 0.10.0
libtpu: 0.0.40
codegen_flags: <defaults>
</compile_context>

<pallas_src>
import math

import jax
import jax.numpy as jnp
from jax import lax
from jax.experimental import pallas as pl
from jax.experimental.pallas import tpu as pltpu


_VMEM_LIMIT_BYTES = 48 * 1024 * 1024   # explicit scoped-VMEM limit (v7x-safe)
_VMEM_TILE_BUDGET = 32 * 1024 * 1024   # tile picker budgets against this


def _make_kernel(mode, use_out_acc):
    """Kernel factory.

    mode:
      "lane_reduce"  : dYpred == 1, tk % 128 == 0. VPU-only adds into a
                       lane-dense (tm, 128) accumulator; single cross-lane
                       reduce at the last k step.
      "simple_reduce": dYpred == 1 fallback (tk < 128). Per-k lane reduce.
      "matmul_t"     : 1 < dYpred < 128. Layer 2 as (dYpred, tk) x (tm, tk)^T
                       so the acc/output block is lane-dense in tm; the wrapper
                       transposes the (dYpred, B) result back.
      "matmul"       : dYpred >= 128. Standard (tm, dYpred) layer-2 matmul.
    use_out_acc: accumulate directly into the (f32) output block, which is
                 resident across the reduction axis, instead of a VMEM scratch.
    """

    def body(x_ref, w1_ref, w2_ref, o_ref, acc_ref):
        k = pl.program_id(1)
        acc = o_ref if acc_ref is None else acc_ref

        @pl.when(k == 0)
        def _():
            acc[...] = jnp.zeros(acc.shape, acc.dtype)

        # Layer 1 on the MXU: contract x (tm, dXin) with the W1 tile (tk, dXin)
        # along dXin. W1 stays in its natural nn.Linear (out, in) layout — no
        # wrapper transpose and no per-call HBM transpose op.
        h = lax.dot_general(
            x_ref[...], w1_ref[...],
            dimension_numbers=(((1,), (1,)), ((), ())),
            preferred_element_type=jnp.float32)
        h = jnp.maximum(h, 0.0)

        if mode == "lane_reduce":
            # dYpred == 1: second layer is a VPU multiply; the cross-lane
            # reduce is deferred to the final k step. Static, lane-aligned
            # 128-wide slices -> pure VPU adds, no per-k XLU work.
            prod = h * w2_ref[...].astype(jnp.float32)          # (tm, tk)
            tk_ = prod.shape[1]
            partial = prod[:, 0:128]
            for j in range(1, tk_ // 128):
                partial = partial + prod[:, j * 128:(j + 1) * 128]
            acc[...] += partial                                 # (tm, 128)
        elif mode == "simple_reduce":
            acc[...] += jnp.sum(h * w2_ref[...].astype(jnp.float32),
                                axis=-1, keepdims=True)         # (tm, 1)
        elif mode == "matmul_t":
            # Lane-dense layer 2: (dYpred, tk) x (tm, tk)^T -> (dYpred, tm).
            acc[...] += lax.dot_general(
                w2_ref[...], h.astype(w2_ref.dtype),
                dimension_numbers=(((1,), (1,)), ((), ())),
                preferred_element_type=jnp.float32)
        else:  # "matmul"
            acc[...] += lax.dot_general(
                h.astype(w2_ref.dtype), w2_ref[...],
                dimension_numbers=(((1,), (1,)), ((), ())),
                preferred_element_type=jnp.float32)

        if not use_out_acc:
            @pl.when(k == pl.num_programs(1) - 1)
            def _():
                if mode == "lane_reduce":
                    o_ref[...] = jnp.sum(acc[...], axis=-1,
                                         keepdims=True).astype(o_ref.dtype)
                else:
                    o_ref[...] = acc[...].astype(o_ref.dtype)

    if use_out_acc:
        return lambda x_ref, w1_ref, w2_ref, o_ref: body(
            x_ref, w1_ref, w2_ref, o_ref, None)
    return body


def _pick_tile_k(dW1):
    for t in (512, 256, 128):
        if dW1 % t == 0:
            return t
    return dW1  # full (always legal: block dim == array dim)


def _vmem_per_step_bytes(tm, tk, dXin, dYpred, in_itemsize, mode):
    """Rough per-grid-step VMEM footprint (double-buffered I/O + intermediates)."""
    lane = 128
    x_t = tm * dXin * in_itemsize
    w1_t = tk * dXin * in_itemsize
    w2_t = max(dYpred, 8) * tk * in_itemsize
    h_t = tm * tk * 4
    if mode in ("lane_reduce", "simple_reduce"):
        acc = tm * lane * 4
        out_t = tm * lane * 4
    elif mode == "matmul_t":
        acc = max(dYpred, 8) * max(tm, lane) * 4
        out_t = acc
    else:
        acc = tm * max(dYpred, lane) * 4
        out_t = acc
    return 2 * (x_t + w1_t + w2_t + out_t) + h_t + acc


def _pick_tile_m(B, budget_fn):
    """Largest divisor batch tile that fits the VMEM budget; prefers >= 2 batch
    programs so the parallel axis shards across v7x's 2 TensorCores."""
    cands = (8192, 4096, 2048, 1024, 512, 256, 128, 64, 32, 16, 8)
    fitting = [t for t in cands
               if t <= B and B % t == 0 and budget_fn(t) <= _VMEM_TILE_BUDGET]
    for t in fitting:               # descending -> effectively caps tm at B//2
        if B // t >= 2:
            return t
    if fitting:
        return fitting[0]
    return B                        # full-array fallback (always legal)


def two_layer_relu(x, w1, w2, *, use_bf16_mxu=False):
    """x: (B, dXin); w1: (dW1, dXin); w2: (dYpred, dW1)  -> (B, dYpred)."""
    B, dXin = x.shape
    dW1, dXin_w = w1.shape
    dYpred, dW1_w = w2.shape
    assert dXin_w == dXin and dW1_w == dW1

    out_dtype = x.dtype
    if use_bf16_mxu:
        # Opt-in: bf16 MXU operands with f32 accumulation (~2-4x MXU throughput
        # on v6e/v7x, halves x/W1/W2 HBM traffic). Breaks the 1e-5 tolerance.
        x = x.astype(jnp.bfloat16)
        w1 = w1.astype(jnp.bfloat16)
        w2 = w2.astype(jnp.bfloat16)
    in_itemsize = jnp.dtype(x.dtype).itemsize
    out_itemsize = jnp.dtype(out_dtype).itemsize

    tk = _pick_tile_k(dW1)            # hidden tile (reduction axis, last in grid)
    if dYpred == 1:
        mode = "lane_reduce" if tk % 128 == 0 else "simple_reduce"
    elif dYpred < 128:
        mode = "matmul_t"
    else:
        mode = "matmul"

    tm = _pick_tile_m(
        B, lambda t: _vmem_per_step_bytes(t, tk, dXin, dYpred, in_itemsize, mode))
    if mode == "matmul_t" and not (tm % 128 == 0 or tm == B):
        mode = "matmul"               # keep the transposed out block lane-legal

    grid_m, grid_k = B // tm, dW1 // tk
    grid = (grid_m, grid_k)

    # f32 outputs accumulate directly into the resident output block.
    use_out_acc = (out_dtype == jnp.float32) and mode != "lane_reduce"

    if mode in ("lane_reduce", "simple_reduce"):
        out_shape = jax.ShapeDtypeStruct((B, 1), out_dtype)
        out_spec = pl.BlockSpec((tm, 1), lambda i, k: (i, 0))
        scratch = [pltpu.VMEM((tm, 128), jnp.float32)] if mode == "lane_reduce" \
            else [pltpu.VMEM((tm, 1), jnp.float32)]
    elif mode == "matmul_t":
        out_shape = jax.ShapeDtypeStruct((dYpred, B), out_dtype)
        out_spec = pl.BlockSpec((dYpred, tm), lambda i, k: (0, i))
        scratch = [pltpu.VMEM((dYpred, tm), jnp.float32)]
    else:
        out_shape = jax.ShapeDtypeStruct((B, dYpred), out_dtype)
        out_spec = pl.BlockSpec((tm, dYpred), lambda i, k: (i, 0))
        scratch = [pltpu.VMEM((tm, dYpred), jnp.float32)]
    if use_out_acc:
        scratch = []

    # W1/W2 tiles are re-streamed once per batch tile; x and the output once.
    cost = pl.CostEstimate(
        flops=2 * B * dXin * dW1 + 2 * B * dW1 * dYpred,
        transcendentals=0,
        bytes_accessed=(x.size * in_itemsize
                        + grid_m * (w1.size + w2.size) * in_itemsize
                        + B * dYpred * out_itemsize))

    result = pl.pallas_call(
        _make_kernel(mode, use_out_acc),
        out_shape=out_shape,
        grid=grid,
        in_specs=[
            pl.BlockSpec((tm, dXin), lambda i, k: (i, 0)),     # x tile
            pl.BlockSpec((tk, dXin), lambda i, k: (k, 0)),     # W1 tile (natural layout)
            pl.BlockSpec((dYpred, tk), lambda i, k: (0, k)),   # W2 tile (natural layout)
        ],
        out_specs=out_spec,
        scratch_shapes=scratch,
        compiler_params=pltpu.CompilerParams(
            dimension_semantics=("parallel", "arbitrary"),
            vmem_limit_bytes=_VMEM_LIMIT_BYTES),
        cost_estimate=cost,
    )(x, w1, w2)

    if mode == "matmul_t":
        result = result.T             # (dYpred, B) -> (B, dYpred); tiny array
    return result


def xavier_uniform(key, shape):
    # torch.nn.init.xavier_uniform_ on a Linear weight (fan_out, fan_in):
    fan_out, fan_in = shape
    bound = math.sqrt(6.0 / (fan_in + fan_out))
    return jax.random.uniform(key, shape, dtype=jnp.float32,
                              minval=-bound, maxval=bound)


def _ref(x, w1, w2):
    return jnp.maximum(x @ w1.T, 0.0) @ w2.T


if __name__ == "__main__":
    # 1) Nominal module-sized shapes: dXin=16, dW1=32, dYpred=1, batch=8.
    B, dXin, dW1, dYpred = 8, 16, 32, 1
    kx, kw1, kw2 = jax.random.split(jax.random.PRNGKey(0), 3)
    x = jax.random.normal(kx, (B, dXin), dtype=jnp.float32)
    w1 = xavier_uniform(kw1, (dW1, dXin))     # nn.Linear(dXin, dW1).weight
    w2 = xavier_uniform(kw2, (dYpred, dW1))   # nn.Linear(dW1, dYpred).weight
    y = jax.block_until_ready(two_layer_relu(x, w1, w2))
    assert y.shape == (B, dYpred)
    assert jnp.allclose(y, _ref(x, w1, w2), atol=1e-5, rtol=1e-5)

    # 2) dYpred > 1: exercises the lane-dense transposed layer-2 path.
    B2, dXin2, dW12, dYpred2 = 512, 64, 1024, 8
    kx2, kw12, kw22 = jax.random.split(jax.random.PRNGKey(1), 3)
    x2 = jax.random.normal(kx2, (B2, dXin2), dtype=jnp.float32)
    w12 = xavier_uniform(kw12, (dW12, dXin2))
    w22 = xavier_uniform(kw22, (dYpred2, dW12))
    y2 = jax.block_until_ready(two_layer_relu(x2, w12, w22))
    assert y2.shape == (B2, dYpred2)
    assert jnp.allclose(y2, _ref(x2, w12, w22), atol=1e-4, rtol=1e-4)

    # 3) dYpred == 1 with a 128-multiple hidden tile: exercises the deferred
    #    lane-reduce accumulator path and the tiled reduction axis.
    B3, dXin3, dW13, dYpred3 = 256, 64, 512, 1
    kx3, kw13, kw23 = jax.random.split(jax.random.PRNGKey(2), 3)
    x3 = jax.random.normal(kx3, (B3, dXin3), dtype=jnp.float32)
    w13 = xavier_uniform(kw13, (dW13, dXin3))
    w23 = xavier_uniform(kw23, (dYpred3, dW13))
    y3 = jax.block_until_ready(two_layer_relu(x3, w13, w23))
    assert y3.shape == (B3, dYpred3)
    assert jnp.allclose(y3, _ref(x3, w13, w23), atol=1e-4, rtol=1e-4)

    # 4) Opt-in bf16 MXU path (f32 accumulation): loose tolerance by design.
    y4 = jax.block_until_ready(two_layer_relu(x2, w12, w22, use_bf16_mxu=True))
    assert jnp.allclose(y4, _ref(x2, w12, w22), atol=5e-2, rtol=5e-2)

    print("KERNEL_OK")
</pallas_src>

<mosaic_0001>
module attributes {stable_mosaic.version = 11 : i64} {
  func.func @_lambda_(%arg0: i32, %arg1: i32, %arg2: memref<8x16xf32, #tpu.memory_space<vmem>>, %arg3: memref<32x16xf32, #tpu.memory_space<vmem>>, %arg4: memref<1x32xf32, #tpu.memory_space<vmem>>, %arg5: memref<8x1xf32, #tpu.memory_space<vmem>>) attributes {dimension_semantics = [#tpu.dimension_semantics<parallel>, #tpu.dimension_semantics<arbitrary>], iteration_bounds = array<i64: 1, 1>, scalar_prefetch = 0 : i64, scratch_operands = 0 : i64, tpu.core_type = #tpu.core_type<tc>, window_params = [{transform_indices = @transform_0, window_bounds = array<i64: 8, 16>}, {transform_indices = @transform_1, window_bounds = array<i64: 32, 16>}, {transform_indices = @transform_2, window_bounds = array<i64: 1, 32>}, {transform_indices = @transform_3, window_bounds = array<i64: 8, 1>}]} {
    %c0_i32 = arith.constant 0 : i32
    %0 = arith.cmpi eq, %arg1, %c0_i32 : i32
    %1 = arith.extui %0 : i1 to i32
    %c0_i32_0 = arith.constant 0 : i32
    %2 = arith.cmpi ne, %1, %c0_i32_0 : i32
    scf.if %2 {
      %cst_12 = arith.constant 0.000000e+00 : f32
      %16 = vector.broadcast %cst_12 : f32 to vector<8x1xf32>
      %c0_13 = arith.constant 0 : index
      %c0_14 = arith.constant 0 : index
      %17 = vector.load %arg5[%c0_13, %c0_14] : memref<8x1xf32, #tpu.memory_space<vmem>>, vector<8x1xf32>
      tpu.vector_store %arg5[%c0_13, %c0_14], %16 {strides = array<i32>} : memref<8x1xf32, #tpu.memory_space<vmem>>, vector<8x1xf32>,
    } else {
    }
    %c0 = arith.constant 0 : index
    %c0_1 = arith.constant 0 : index
    %3 = vector.load %arg2[%c0, %c0_1] : memref<8x16xf32, #tpu.memory_space<vmem>>, vector<8x16xf32>
    %c0_2 = arith.constant 0 : index
    %c0_3 = arith.constant 0 : index
    %4 = vector.load %arg3[%c0_2, %c0_3] : memref<32x16xf32, #tpu.memory_space<vmem>>, vector<32x16xf32>
    %cst = arith.constant dense<0.000000e+00> : vector<8x32xf32>
    %5 = tpu.matmul %3, %4, %cst {dimension_numbers = #tpu.dot_dimension_numbers<[1], [1], [0], [0], [0, 0, 1, 0], [], []>} : vector<8x16xf32>, vector<32x16xf32>, vector<8x32xf32> -> vector<8x32xf32>
    %cst_4 = arith.constant 0.000000e+00 : f32
    %6 = vector.broadcast %cst_4 : f32 to vector<8x32xf32>
    %7 = arith.maximumf %5, %6 : vector<8x32xf32>
    %c0_5 = arith.constant 0 : index
    %c0_6 = arith.constant 0 : index
    %8 = vector.load %arg5[%c0_5, %c0_6] : memref<8x1xf32, #tpu.memory_space<vmem>>, vector<8x1xf32>
    %c0_7 = arith.constant 0 : index
    %c0_8 = arith.constant 0 : index
    %9 = vector.load %arg4[%c0_7, %c0_8] : memref<1x32xf32, #tpu.memory_space<vmem>>, vector<1x32xf32>
    %10 = vector.broadcast %9 : vector<1x32xf32> to vector<8x32xf32>
    %11 = arith.mulf %7, %10 : vector<8x32xf32>
    %cst_9 = arith.constant dense<0.000000e+00> : vector<8xf32>
    %12 = vector.multi_reduction <add>, %11, %cst_9 [1] : vector<8x32xf32> to vector<8xf32>
    %13 = vector.shape_cast %12 : vector<8xf32> to vector<8x1xf32>
    %14 = arith.addf %8, %13 : vector<8x1xf32>
    %c0_10 = arith.constant 0 : index
    %c0_11 = arith.constant 0 : index
    %15 = vector.load %arg5[%c0_10, %c0_11] : memref<8x1xf32, #tpu.memory_space<vmem>>, vector<8x1xf32>
    tpu.vector_store %arg5[%c0_10, %c0_11], %14 {strides = array<i32>} : memref<8x1xf32, #tpu.memory_space<vmem>>, vector<8x1xf32>,
    return
  }
  func.func @transform_0(%arg0: i32, %arg1: i32) -> (i32, i32) {
    %c0_i32 = arith.constant 0 : i32
    %c0_i32_0 = arith.constant 0 : i32
    return %arg0, %c0_i32 : i32, i32
  }
  func.func @transform_1(%arg0: i32, %arg1: i32) -> (i32, i32) {
    %c0_i32 = arith.constant 0 : i32
    %c0_i32_0 = arith.constant 0 : i32
    return %arg1, %c0_i32 : i32, i32
  }
  func.func @transform_2(%arg0: i32, %arg1: i32) -> (i32, i32) {
    %c0_i32 = arith.constant 0 : i32
    %c0_i32_0 = arith.constant 0 : i32
    return %c0_i32, %arg1 : i32, i32
  }
  func.func @transform_3(%arg0: i32, %arg1: i32) -> (i32, i32) {
    %c0_i32 = arith.constant 0 : i32
    %c0_i32_0 = arith.constant 0 : i32
    return %arg0, %c0_i32 : i32, i32
  }
}

</mosaic_0001>

<bundles_post_ra>
// kernel: tpu_custom_call.1
= control target key start
LH: loop header
LB: loop body
LE: loop exit
PB: predicated region body
PF: predicated region fallthrough
CT: control target
= control target key end

     0   :  { %vm25_vm0 = vcmask 130048   ;;  %vm18_vm1 = vcmask 7168   ;;  %v165_v0 = vmov 0.0|0.0   ;;  %v166_v3 = vmov 0.0   ;;  %s220_s1 = inlined_call_operand.vmem [shape: f32[32,16], index: 1, kind: input, shape index: {}]   ;;  %s221_s3 = inlined_call_operand.vmem [shape: f32[8,1], index: 3, kind: output, shape index: {}]   ;;  %s222_s0 = inlined_call_operand.vmem [shape: f32[8,16], index: 0, kind: input, shape index: {}]   ;;  %s223_s2 = inlined_call_operand.vmem [shape: f32[1,32], index: 2, kind: input, shape index: {}]  }
   0x1   :  { %154 = vmatprep.subr.bf16.mxu0 %v165_v0  ;;  %v21_v1 = vld [vmem:[%s220_s1] sm:$0xff]  ;;  %v22_v2 = vld [vmem:[%s220_s1 + $0x8] sm:$0xff]  ;;  %vm156_vm2 = vmpackc.low %vm25_vm0, %vm25_vm0  ;;  %19 = vst.msk [vmem:[%s221_s3] sm:$0xff] %vm18_vm1, %v166_v3  ;;  %vm167_vm3 = vmmov 0   ;;  %vm121_vm4 = vcmask 261120  }
   0x2   :  { %v155_v4 = vpack.c.bf16 %v22_v2, %v21_v1  ;;  %151 = vmatprep.mubr.msk.f32.mxu0 %vm167_vm3, %v166_v3  ;;  %v23_v5 = vld [vmem:[%s220_s1 + $0x10] sm:$0xff]  ;;  %v24_v6 = vld [vmem:[%s220_s1 + $0x18] sm:$0xff]  ;;  %v20_v8 = vld [vmem:[%s222_s0] sm:$0xff] }
   0x3   :  { %v159_v7 = vpack.c.bf16 %v24_v6, %v23_v5  ;;  %v137_v10 = vld [vmem:[%s223_s2] ss:$0 sm:$0xff] }
   0x4   :  { %157 = vmatpush3.bf16.xpose.msk.msra.mxu0 %vm156_vm2, %v155_v4 }
   0x5   :  { %158 = vmatprep.subr.bf16.mxu0 %v165_v0 }
   0x8   :  { %v112_v15 = vld [vmem:[%s221_s3] sm:$0xff] }
   0xc   :  { %161 = vmatpush3.bf16.xpose.msk.msra.mxu0 %vm156_vm2, %v159_v7 }
  0x13   :  { %152 = vmatmul.mubr.msk.f32.vlgmr.msra.gmra.mrb[0].mxu0 %vm25_vm0, %v20_v8 }
  0xe6   :  { %v107_v9 = vpop.f32.mrb[0].mxu0 }
  0xe7   :  { %v111_v11 = vmax.f32 %v107_v9, 0.0  ;;  %v153_v12 = vpop.f32.mrb[1].mxu0 }
  0xe9   :  { %v120_v13 = vmul.f32 %v137_v10, %v111_v11 }
  0xeb   :  { %v122_v14 = vsel %vm121_vm4, %v120_v13, 0.0 }
  0xec   :  { %123 = vadd.xlane.f32.xlu0 %v122_v14 }
 0x179   :  { %v124_v16 = vpop.xlane.xlu0 %123 }
 0x17a   :  { %v125_v17 = vadd.f32 %v124_v16, %v112_v15 }
 0x17c   :  { %127 = vst.msk [vmem:[%s221_s3] sm:$0xff] %vm18_vm1, %v125_v17 }

</bundles_post_ra>
